<compile_context>
chip_gen: v7x
topology: tpu7x:2x2x1
jax: 0.10.0
libtpu: 0.0.40
codegen_flags: <defaults>
</compile_context>

<pallas_src>
import functools

import jax
import jax.numpy as jnp
import numpy as np
from jax import lax
from jax.experimental import pallas as pl
from jax.experimental.pallas import tpu as pltpu


def _round_up(a, b):
    return (a + b - 1) // b * b


def _cdiv(a, b):
    return -(-a // b)


def _grad_block_kernel(x_ref, m_ref, o_ref, *, lp, shift_d, shift_h, shift_w,
                       row_chunk):
    # x_ref: (b_tile, lp) input rows; m_ref: (3, lp) {0,1} interior masks;
    # o_ref: (b_tile, lp) output.  All stores are full-lane-width (lp % 128==0).
    n_chunks = x_ref.shape[0] // row_chunk

    # Hoist mask loads + sublane broadcasts out of the row-chunk loop.
    m_d = jnp.broadcast_to(m_ref[0:1, :], (row_chunk, lp))
    m_h = jnp.broadcast_to(m_ref[1:2, :], (row_chunk, lp))
    m_w = jnp.broadcast_to(m_ref[2:3, :], (row_chunk, lp))

    def central_sq(x, shift):
        s = shift % lp
        if s == 0:  # degenerate axis (size < 3); masked to zero anyway
            return jnp.zeros_like(x)
        fwd = pltpu.roll(x, s, axis=1)       # x[f -/+ s]  (wrap masked away)
        bwd = pltpu.roll(x, lp - s, axis=1)  # x[f +/- s]
        d = fwd - bwd                        # sign irrelevant: squared below
        return d * d

    def chunk(c, carry):
        r = pl.multiple_of(c * row_chunk, row_chunk)
        x = x_ref[pl.ds(r, row_chunk), :].astype(jnp.float32)
        out = central_sq(x, shift_d) * m_d          # D interior
        out = out + central_sq(x, shift_h) * m_h    # H interior
        out = out + central_sq(x, shift_w) * m_w    # W interior
        o_ref[pl.ds(r, row_chunk), :] = out.astype(o_ref.dtype)
        return carry

    lax.fori_loop(0, n_chunks, chunk, 0)


@functools.lru_cache(maxsize=64)
def _interior_masks_np(d, h, w, lp):
    f = np.arange(lp, dtype=np.int64)
    d_idx, h_idx, w_idx = f // (h * w), (f // w) % h, f % w
    return np.stack(
        [
            (d_idx >= 1) & (d_idx <= d - 2),
            (h_idx >= 1) & (h_idx <= h - 2),
            (w_idx >= 1) & (w_idx <= w - 2),
        ]
    ).astype(np.float32)


@functools.partial(jax.jit, static_argnames=("out_dtype",))
def grad_block(x, out_dtype=jnp.float32):
    """x: (N, C, D, H, W). Returns (N, C, D, H, W) in out_dtype (default f32,
    matching the torch.zeros(x.shape) default in the reference module)."""
    N, C, D, H, W = x.shape
    NC, L = N * C, D * H * W
    SUB, LANE = 8, 128
    Lp = _round_up(L, LANE)
    NC8 = _round_up(NC, SUB)            # <= 7 rows of padding

    in_item = np.dtype(x.dtype).itemsize
    out_item = np.dtype(out_dtype).itemsize

    # --- generation-aware VMEM sizing (v7x: 64 MiB / TC, v5e/v6e: 128 MiB) ---
    try:
        cap = int(pltpu.get_tpu_info().vmem_capacity_bytes)
    except Exception:
        cap = 64 * 1024 * 1024          # conservative fallback (v7x per-TC)
    vmem_limit = int(cap * 0.55)
    vmem_budget = vmem_limit // 2

    # --- batch-tile sizing: double-buffered in + out per grid step ----------
    bytes_per_row = 2 * Lp * (in_item + out_item)
    rows = max(SUB, (vmem_budget // max(bytes_per_row, 1)) // SUB * SUB)
    # pipeline depth: >= 8 steps total (>= 4 per v7x core) when there is work.
    min_steps = min(8, NC8 // SUB)
    steps = max(_cdiv(NC8, rows), min_steps)
    b_tile = max(SUB, min(rows, _round_up(_cdiv(NC8, steps), SUB)))
    grid = _cdiv(NC8, b_tile)           # partial last block handled by Pallas
    # TODO(synk): if a single 8-row tile of the flattened volume exceeds the
    # VMEM budget (very large D*H*W), tile the flattened axis with an H*W-lane
    # halo (or tile D with a 1-plane halo) via manual make_async_copy.

    # Keep limit consistent with what the chosen tiles actually need.
    need = 2 * b_tile * Lp * (in_item + out_item) + 2 * 3 * Lp * 4 + (1 << 20)
    vmem_limit = max(vmem_limit, min(int(need * 1.25), int(cap * 0.9)))

    # --- flatten; pad only when necessary (reshape itself is free) ----------
    xf = x.reshape(NC, L)
    if NC8 != NC or Lp != L:
        # TODO(synk): for L % 128 != 0 the pad/slice each cost one extra HBM
        # round trip; folding the partial lane vreg into the kernel would
        # remove it.  Row padding here is <= 7 rows.
        xf = jnp.pad(xf, ((0, NC8 - NC), (0, Lp - L)))

    masks = jnp.asarray(_interior_masks_np(D, H, W, Lp))  # (3, Lp), {0,1} f32

    kernel = functools.partial(
        _grad_block_kernel, lp=Lp, shift_d=H * W, shift_h=W, shift_w=1,
        row_chunk=SUB,
    )
    out = pl.pallas_call(
        kernel,
        out_shape=jax.ShapeDtypeStruct((NC8, Lp), out_dtype),
        grid_spec=pltpu.PrefetchScalarGridSpec(
            num_scalar_prefetch=0,
            grid=(grid,),
            in_specs=[
                pl.BlockSpec((b_tile, Lp), lambda b: (b, 0)),
                # constant block index -> tiny mask tile is not re-fetched
                pl.BlockSpec((3, Lp), lambda b: (0, 0)),
            ],
            out_specs=pl.BlockSpec((b_tile, Lp), lambda b: (b, 0)),
        ),
        compiler_params=pltpu.CompilerParams(
            dimension_semantics=("parallel",),
            vmem_limit_bytes=vmem_limit,
        ),
        cost_estimate=pl.CostEstimate(
            flops=11 * NC8 * Lp,
            transcendentals=0,
            bytes_accessed=NC8 * Lp * (in_item + out_item),
        ),
    )(xf, masks)

    if NC8 != NC or Lp != L:
        out = out[:NC, :L]
    return out.reshape(N, C, D, H, W)


def grad_block_ref(x):
    # Pure-JAX reference mirroring the PyTorch forward.
    x = x.astype(jnp.float32)
    dx = x[:, :, 2:, :, :] - x[:, :, :-2, :, :]
    dy = x[:, :, :, 2:, :] - x[:, :, :, :-2, :]
    dz = x[:, :, :, :, 2:] - x[:, :, :, :, :-2]
    out = jnp.zeros(x.shape, jnp.float32)
    out = out.at[:, :, 1:-1, :, :].set(dx ** 2)
    out = out.at[:, :, :, 1:-1, :].add(dy ** 2)
    out = out.at[:, :, :, :, 1:-1].add(dz ** 2)
    return out


if __name__ == "__main__":
    key = jax.random.PRNGKey(0)

    # primary test: lane-dense path (D*H*W already a multiple of 128)
    N, C, D, H, W = 2, 4, 8, 16, 16
    x = jax.random.normal(key, (N, C, D, H, W), dtype=jnp.float32)
    out = jax.block_until_ready(grad_block(x))
    ref = grad_block_ref(x)
    assert out.shape == (N, C, D, H, W) and out.dtype == jnp.float32
    assert jnp.allclose(out, ref, atol=1e-5, rtol=1e-5)

    # secondary test: odd shape exercising the row/lane padding path
    x2 = jax.random.normal(jax.random.PRNGKey(1), (1, 2, 5, 6, 7), jnp.float32)
    out2 = jax.block_until_ready(grad_block(x2))
    assert jnp.allclose(out2, grad_block_ref(x2), atol=1e-5, rtol=1e-5)

    print("KERNEL_OK")
</pallas_src>

<mosaic_0001>
module attributes {stable_mosaic.version = 11 : i64} {
  func.func @_grad_block_kernel(%arg0: i32, %arg1: memref<8x2048xf32, #tpu.memory_space<vmem>>, %arg2: memref<3x2048xf32, #tpu.memory_space<vmem>>, %arg3: memref<8x2048xf32, #tpu.memory_space<vmem>>) attributes {dimension_semantics = [#tpu.dimension_semantics<parallel>], iteration_bounds = array<i64: 1>, scalar_prefetch = 0 : i64, scratch_operands = 0 : i64, tpu.core_type = #tpu.core_type<tc>, window_params = [{transform_indices = @transform_0, window_bounds = array<i64: 8, 2048>}, {pipeline_mode = #tpu.pipeline_mode<synchronous>, transform_indices = @transform_1, window_bounds = array<i64: 3, 2048>}, {transform_indices = @transform_2, window_bounds = array<i64: 8, 2048>}]} {
    %c0 = arith.constant 0 : index
    %c0_0 = arith.constant 0 : index
    %0 = vector.load %arg2[%c0, %c0_0] : memref<3x2048xf32, #tpu.memory_space<vmem>>, vector<1x2048xf32>
    %1 = vector.shape_cast %0 : vector<1x2048xf32> to vector<1x2048xf32>
    %2 = vector.broadcast %1 : vector<1x2048xf32> to vector<8x2048xf32>
    %c1 = arith.constant 1 : index
    %c0_1 = arith.constant 0 : index
    %3 = vector.load %arg2[%c1, %c0_1] : memref<3x2048xf32, #tpu.memory_space<vmem>>, vector<1x2048xf32>
    %4 = vector.shape_cast %3 : vector<1x2048xf32> to vector<1x2048xf32>
    %5 = vector.broadcast %4 : vector<1x2048xf32> to vector<8x2048xf32>
    %c2 = arith.constant 2 : index
    %c0_2 = arith.constant 0 : index
    %6 = vector.load %arg2[%c2, %c0_2] : memref<3x2048xf32, #tpu.memory_space<vmem>>, vector<1x2048xf32>
    %7 = vector.shape_cast %6 : vector<1x2048xf32> to vector<1x2048xf32>
    %8 = vector.broadcast %7 : vector<1x2048xf32> to vector<8x2048xf32>
    %c0_i32 = arith.constant 0 : i32
    %c8_i32 = arith.constant 8 : i32
    %9 = arith.muli %c0_i32, %c8_i32 : i32
    %10 = tpu.assume_multiple %9, 8 : i32
    %11 = arith.index_cast %10 : i32 to index
    %c0_3 = arith.constant 0 : index
    %12 = vector.load %arg1[%11, %c0_3] : memref<8x2048xf32, #tpu.memory_space<vmem>>, vector<8x2048xf32>
    %c256_i32 = arith.constant 256 : i32
    %13 = tpu.dynamic_rotate %12 by %c256_i32 dim 1 : vector<8x2048xf32>, i32 -> vector<8x2048xf32>
    %c1792_i32 = arith.constant 1792 : i32
    %14 = tpu.dynamic_rotate %12 by %c1792_i32 dim 1 : vector<8x2048xf32>, i32 -> vector<8x2048xf32>
    %15 = arith.subf %13, %14 : vector<8x2048xf32>
    %16 = arith.mulf %15, %15 : vector<8x2048xf32>
    %17 = arith.mulf %16, %2 : vector<8x2048xf32>
    %c16_i32 = arith.constant 16 : i32
    %18 = tpu.dynamic_rotate %12 by %c16_i32 dim 1 : vector<8x2048xf32>, i32 -> vector<8x2048xf32>
    %c2032_i32 = arith.constant 2032 : i32
    %19 = tpu.dynamic_rotate %12 by %c2032_i32 dim 1 : vector<8x2048xf32>, i32 -> vector<8x2048xf32>
    %20 = arith.subf %18, %19 : vector<8x2048xf32>
    %21 = arith.mulf %20, %20 : vector<8x2048xf32>
    %22 = arith.mulf %21, %5 : vector<8x2048xf32>
    %23 = arith.addf %17, %22 : vector<8x2048xf32>
    %c1_i32 = arith.constant 1 : i32
    %24 = tpu.dynamic_rotate %12 by %c1_i32 dim 1 : vector<8x2048xf32>, i32 -> vector<8x2048xf32>
    %c2047_i32 = arith.constant 2047 : i32
    %25 = tpu.dynamic_rotate %12 by %c2047_i32 dim 1 : vector<8x2048xf32>, i32 -> vector<8x2048xf32>
    %26 = arith.subf %24, %25 : vector<8x2048xf32>
    %27 = arith.mulf %26, %26 : vector<8x2048xf32>
    %28 = arith.mulf %27, %8 : vector<8x2048xf32>
    %29 = arith.addf %23, %28 : vector<8x2048xf32>
    %30 = arith.index_cast %10 : i32 to index
    %c0_4 = arith.constant 0 : index
    %31 = vector.load %arg3[%30, %c0_4] : memref<8x2048xf32, #tpu.memory_space<vmem>>, vector<8x2048xf32>
    tpu.vector_store %arg3[%30, %c0_4], %29 {strides = array<i32>} : memref<8x2048xf32, #tpu.memory_space<vmem>>, vector<8x2048xf32>,
    %c1_i32_5 = arith.constant 1 : i32
    return
  }
  func.func @transform_0(%arg0: i32) -> (i32, i32) {
    %c0_i32 = arith.constant 0 : i32
    %c0_i32_0 = arith.constant 0 : i32
    return %arg0, %c0_i32 : i32, i32
  }
  func.func @transform_1(%arg0: i32) -> (i32, i32) {
    %c0_i32 = arith.constant 0 : i32
    %c0_i32_0 = arith.constant 0 : i32
    %c0_i32_1 = arith.constant 0 : i32
    return %c0_i32, %c0_i32_0 : i32, i32
  }
  func.func @transform_2(%arg0: i32) -> (i32, i32) {
    %c0_i32 = arith.constant 0 : i32
    %c0_i32_0 = arith.constant 0 : i32
    return %arg0, %c0_i32 : i32, i32
  }
}

</mosaic_0001>

<bundles_post_ra>
// kernel: grad_block.1
= control target key start
LH: loop header
LB: loop body
LE: loop exit
PB: predicated region body
PF: predicated region fallthrough
CT: control target
= control target key end

     0   :  { %s692_s13 = smov 16   ;;  %s693_s15 = smov 112   ;;  %v16_v16 = vlaneseq  ;;  %s1557_s0 = inlined_call_operand.vmem [shape: f32[8,2048], index: 0, kind: input, shape index: {}]   ;;  %s1558_s1 = inlined_call_operand.vmem [shape: f32[3,2048], index: 1, kind: input, shape index: {}]   ;;  %s1559_s2 = inlined_call_operand.vmem [shape: f32[8,2048], index: 2, kind: output, shape index: {}]  }
   0x1   :  { %v714_v0 = vld [vmem:[%s1557_s0 + $0x10] sm:$0xff]  ;;  %v719_v1 = vld [vmem:[%s1557_s0] sm:$0xff]  ;;  %v726_v2 = vld [vmem:[%s1557_s0 + $0x18] sm:$0xff] }
   0x2   :  { %339 = vrot.lane.b32.xlu1 %v714_v0, %s692_s13  ;;  %335 = vrot.lane.b32.xlu0 %v719_v1, %s692_s13  ;;  %v731_v3 = vld [vmem:[%s1557_s0 + $0x8] sm:$0xff]  ;;  %v743_v5 = vld [vmem:[%s1557_s0 + $0x20] sm:$0xff]  ;;  %v850_v17 = vand.u32 127, %v16_v16 }
   0x3   :  { %v738_v4 = vld [vmem:[%s1557_s0 + $0x28] sm:$0xff]  ;;  %v750_v6 = vld [vmem:[%s1557_s0 + $0x38] sm:$0xff]  ;;  %v755_v7 = vld [vmem:[%s1557_s0 + $0x30] sm:$0xff] }
   0x4   :  { %v762_v8 = vld [vmem:[%s1557_s0 + $0x48] sm:$0xff]  ;;  %v767_v9 = vld [vmem:[%s1557_s0 + $0x40] sm:$0xff]  ;;  %v774_v10 = vld [vmem:[%s1557_s0 + $0x58] sm:$0xff]  ;;  %vm369_vm0 = vcmp.lt.s32.totalorder %v850_v17, 16  ;;  %vm418_vm1 = vcmp.lt.s32.totalorder %v850_v17, 112  ;;  %vm531_vm2 = vcmp.lt.s32.totalorder %v850_v17, 1 }
   0x5   :  { %v779_v11 = vld [vmem:[%s1557_s0 + $0x50] sm:$0xff]  ;;  %v786_v12 = vld [vmem:[%s1557_s0 + $0x68] sm:$0xff]  ;;  %v791_v13 = vld [vmem:[%s1557_s0 + $0x60] sm:$0xff]  ;;  %vm580_vm3 = vcmp.lt.s32.totalorder %v850_v17, 127 }
   0x6   :  { %341 = vrot.lane.b32.xlu1 %v726_v2, %s692_s13  ;;  %337 = vrot.lane.b32.xlu0 %v731_v3, %s692_s13  ;;  %v798_v14 = vld [vmem:[%s1557_s0 + $0x78] sm:$0xff]  ;;  %v803_v15 = vld [vmem:[%s1557_s0 + $0x70] sm:$0xff]  ;;  %s694_s0 = smov 1  }
   0xa   :  { %345 = vrot.lane.b32.xlu1 %v738_v4, %s692_s13  ;;  %343 = vrot.lane.b32.xlu0 %v743_v5, %s692_s13 }
   0xe   :  { %349 = vrot.lane.b32.xlu1 %v750_v6, %s692_s13  ;;  %347 = vrot.lane.b32.xlu0 %v755_v7, %s692_s13 }
  0x12   :  { %353 = vrot.lane.b32.xlu1 %v762_v8, %s692_s13  ;;  %351 = vrot.lane.b32.xlu0 %v767_v9, %s692_s13 }
  0x16   :  { %357 = vrot.lane.b32.xlu1 %v774_v10, %s692_s13  ;;  %355 = vrot.lane.b32.xlu0 %v779_v11, %s692_s13 }
  0x1a   :  { %361 = vrot.lane.b32.xlu1 %v786_v12, %s692_s13  ;;  %359 = vrot.lane.b32.xlu0 %v791_v13, %s692_s13 }
  0x1e   :  { %365 = vrot.lane.b32.xlu1 %v798_v14, %s692_s13  ;;  %363 = vrot.lane.b32.xlu0 %v803_v15, %s692_s13  ;;  %s695_s13 = smov 127  }
  0x22   :  { %388 = vrot.lane.b32.xlu1 %v731_v3, %s693_s15  ;;  %386 = vrot.lane.b32.xlu0 %v719_v1, %s693_s15 }
  0x26   :  { %392 = vrot.lane.b32.xlu1 %v726_v2, %s693_s15  ;;  %390 = vrot.lane.b32.xlu0 %v714_v0, %s693_s15 }
  0x2a   :  { %396 = vrot.lane.b32.xlu1 %v738_v4, %s693_s15  ;;  %394 = vrot.lane.b32.xlu0 %v743_v5, %s693_s15 }
  0x2e   :  { %400 = vrot.lane.b32.xlu1 %v750_v6, %s693_s15  ;;  %398 = vrot.lane.b32.xlu0 %v755_v7, %s693_s15 }
  0x32   :  { %404 = vrot.lane.b32.xlu1 %v762_v8, %s693_s15  ;;  %402 = vrot.lane.b32.xlu0 %v767_v9, %s693_s15 }
  0x36   :  { %408 = vrot.lane.b32.xlu1 %v774_v10, %s693_s15  ;;  %406 = vrot.lane.b32.xlu0 %v779_v11, %s693_s15 }
  0x3a   :  { %412 = vrot.lane.b32.xlu1 %v786_v12, %s693_s15  ;;  %410 = vrot.lane.b32.xlu0 %v791_v13, %s693_s15 }
  0x3e   :  { %416 = vrot.lane.b32.xlu1 %v798_v14, %s693_s15  ;;  %414 = vrot.lane.b32.xlu0 %v803_v15, %s693_s15 }
  0x42   :  { %501 = vrot.lane.b32.xlu1 %v731_v3, %s694_s0  ;;  %499 = vrot.lane.b32.xlu0 %v719_v1, %s694_s0 }
  0x46   :  { %505 = vrot.lane.b32.xlu1 %v726_v2, %s694_s0  ;;  %503 = vrot.lane.b32.xlu0 %v714_v0, %s694_s0 }
  0x4a   :  { %509 = vrot.lane.b32.xlu1 %v738_v4, %s694_s0  ;;  %507 = vrot.lane.b32.xlu0 %v743_v5, %s694_s0 }
  0x4e   :  { %513 = vrot.lane.b32.xlu1 %v750_v6, %s694_s0  ;;  %511 = vrot.lane.b32.xlu0 %v755_v7, %s694_s0 }
  0x52   :  { %517 = vrot.lane.b32.xlu1 %v762_v8, %s694_s0  ;;  %515 = vrot.lane.b32.xlu0 %v767_v9, %s694_s0 }
  0x56   :  { %521 = vrot.lane.b32.xlu1 %v774_v10, %s694_s0  ;;  %519 = vrot.lane.b32.xlu0 %v779_v11, %s694_s0 }
  0x5a   :  { %525 = vrot.lane.b32.xlu1 %v786_v12, %s694_s0  ;;  %523 = vrot.lane.b32.xlu0 %v791_v13, %s694_s0 }
  0x5e   :  { %529 = vrot.lane.b32.xlu1 %v798_v14, %s694_s0  ;;  %527 = vrot.lane.b32.xlu0 %v803_v15, %s694_s0 }
  0x62   :  { %550 = vrot.lane.b32.xlu1 %v731_v3, %s695_s13  ;;  %548 = vrot.lane.b32.xlu0 %v719_v1, %s695_s13 }
  0x66   :  { %554 = vrot.lane.b32.xlu1 %v726_v2, %s695_s13  ;;  %552 = vrot.lane.b32.xlu0 %v714_v0, %s695_s13 }
  0x6a   :  { %558 = vrot.lane.b32.xlu1 %v738_v4, %s695_s13  ;;  %556 = vrot.lane.b32.xlu0 %v743_v5, %s695_s13 }
  0x6e   :  { %562 = vrot.lane.b32.xlu1 %v750_v6, %s695_s13  ;;  %560 = vrot.lane.b32.xlu0 %v755_v7, %s695_s13 }
  0x72   :  { %566 = vrot.lane.b32.xlu1 %v762_v8, %s695_s13  ;;  %564 = vrot.lane.b32.xlu0 %v767_v9, %s695_s13 }
  0x74   :  { %v340_v18 = vpop.permute.xlu1 %339  ;;  %v336_v19 = vpop.permute.xlu0 %335 }
  0x76   :  { %570 = vrot.lane.b32.xlu1 %v774_v10, %s695_s13  ;;  %568 = vrot.lane.b32.xlu0 %v779_v11, %s695_s13 }
  0x78   :  { %v342_v20 = vpop.permute.xlu1 %341  ;;  %v338_v21 = vpop.permute.xlu0 %337 }
  0x79   :  { %v382_v22 = vsel %vm369_vm0, %v340_v18, %v342_v20  ;;  %v859_v23 = vsel %vm369_vm0, %v338_v21, %v340_v18  ;;  %v384_v24 = vsel %vm369_vm0, %v336_v19, %v338_v21 }
  0x7a   :  { %574 = vrot.lane.b32.xlu1 %v786_v12, %s695_s13  ;;  %572 = vrot.lane.b32.xlu0 %v791_v13, %s695_s13 }
  0x7c   :  { %v346_v25 = vpop.permute.xlu1 %345  ;;  %v344_v26 = vpop.permute.xlu0 %343 }
  0x7d   :  { %v380_v27 = vsel %vm369_vm0, %v344_v26, %v346_v25  ;;  %v869_v28 = vsel %vm369_vm0, %v342_v20, %v344_v26 }
  0x7e   :  { %578 = vrot.lane.b32.xlu1 %v798_v14, %s695_s13  ;;  %576 = vrot.lane.b32.xlu0 %v803_v15, %s695_s13 }
  0x80   :  { %v350_v29 = vpop.permute.xlu1 %349  ;;  %v348_v30 = vpop.permute.xlu0 %347 }
  0x81   :  { %v378_v31 = vsel %vm369_vm0, %v348_v30, %v350_v29  ;;  %v877_v32 = vsel %vm369_vm0, %v346_v25, %v348_v30 }
  0x84   :  { %v354_v33 = vpop.permute.xlu1 %353  ;;  %v352_v34 = vpop.permute.xlu0 %351 }
  0x85   :  { %v376_v35 = vsel %vm369_vm0, %v352_v34, %v354_v33  ;;  %v883_v36 = vsel %vm369_vm0, %v350_v29, %v352_v34 }
  0x88   :  { %v358_v37 = vpop.permute.xlu1 %357  ;;  %v356_v38 = vpop.permute.xlu0 %355 }
  0x89   :  { %v374_v39 = vsel %vm369_vm0, %v356_v38, %v358_v37  ;;  %v889_v40 = vsel %vm369_vm0, %v354_v33, %v356_v38 }
  0x8a   :  { %1572 = vst [vmem:[#allocation2_spill] sm:$0xff] %v889_v40 }
  0x8c   :  { %v362_v41 = vpop.permute.xlu1 %361  ;;  %v360_v42 = vpop.permute.xlu0 %359 }
  0x8d   :  { %v372_v43 = vsel %vm369_vm0, %v360_v42, %v362_v41  ;;  %v895_v44 = vsel %vm369_vm0, %v358_v37, %v360_v42  ;;  %v287_v37 = vsub.f32 %v803_v15, %v714_v0 }
  0x8e   :  { %1573 = vst [vmem:[#allocation3_spill] sm:$0xff] %v895_v44 }
  0x90   :  { %v366_v45 = vpop.permute.xlu1 %365  ;;  %v364_v46 = vpop.permute.xlu0 %363 }
  0x91   :  { %v899_v47 = vsel %vm369_vm0, %v366_v45, %v336_v19  ;;  %v370_v48 = vsel %vm369_vm0, %v364_v46, %v366_v45  ;;  %v905_v49 = vsel %vm369_vm0, %v362_v41, %v364_v46 }
  0x92   :  { %1574 = vst [vmem:[#allocation4_spill] sm:$0xff] %v905_v49 }
  0x94   :  { %v907_v50 = vpop.permute.xlu1 %388  ;;  %v909_v51 = vpop.permute.xlu0 %386 }
  0x98   :  { %v912_v52 = vpop.permute.xlu1 %392  ;;  %v914_v53 = vpop.permute.xlu0 %390 }
  0x99   :  { %v432_v54 = vsel %vm418_vm1, %v907_v50, %v914_v53 }
  0x9a   :  { %v920_v55 = vsub.f32 %v384_v24, %v432_v54  ;;  %v303_v54 = vmul.f32 %v287_v37, %v287_v37 }
  0x9c   :  { %v922_v56 = vpop.permute.xlu1 %396  ;;  %v924_v57 = vpop.permute.xlu0 %394 }
  0x9d   :  { %v430_v58 = vsel %vm418_vm1, %v912_v52, %v924_v57 }
  0x9e   :  { %v930_v59 = vsub.f32 %v382_v22, %v430_v58 }
  0xa0   :  { %v932_v60 = vpop.permute.xlu1 %400  ;;  %v934_v61 = vpop.permute.xlu0 %398 }
  0xa1   :  { %v428_v62 = vsel %vm418_vm1, %v922_v56, %v934_v61 }
  0xa2   :  { %v940_v63 = vsub.f32 %v380_v27, %v428_v62  ;;  %v17_v27 = vshrl.u32 %v16_v16, 7  ;;  %v984_v16 = vld [vmem:[%s1558_s1] ss:$4 sm:$0xff]  ;;  %v288_v62 = vsub.f32 %v798_v14, %v726_v2 }
  0xa4   :  { %v942_v18 = vpop.permute.xlu1 %404  ;;  %v944_v19 = vpop.permute.xlu0 %402  ;;  %v973_v34 = vsub.s32 0, %v17_v27  ;;  %v1000_v58 = vsub.s32 1, %v17_v27  ;;  %v1017_v37 = vsub.s32 3, %v17_v27  ;;  %v1055_v40 = vsub.s32 7, %v17_v27 }
  0xa5   :  { %v426_v20 = vsel %vm418_vm1, %v932_v60, %v944_v19 }
  0xa6   :  { %v950_v21 = vsub.f32 %v378_v31, %v426_v20  ;;  %v19_v46 = vrot.slane %v984_v16, %v973_v34 }
  0xa8   :  { %v952_v22 = vpop.permute.xlu1 %408  ;;  %v954_v24 = vpop.permute.xlu0 %406  ;;  %v1027_v49 = vmul.f32 %v303_v54, %v19_v46  ;;  %v294_v54 = vsub.f32 %v738_v4, %v762_v8  ;;  %v295_v46 = vsub.f32 %v755_v7, %v779_v11 }
  0xa9   :  { %v424_v25 = vsel %vm418_vm1, %v942_v18, %v954_v24 }
  0xaa   :  { %v960_v26 = vsub.f32 %v376_v35, %v424_v25  ;;  %1585 = vst [vmem:[#allocation15_spill] sm:$0xff] %v1027_v49 }
  0xac   :  { %1575 = vst [vmem:[#allocation5_spill] sm:$0xff] %v960_v26  ;;  %v963_v29 = vpop.permute.xlu1 %412  ;;  %v965_v30 = vpop.permute.xlu0 %410  ;;  %v1037_v26 = vsub.s32 5, %v17_v27 }
  0xad   :  { %1576 = vst [vmem:[#allocation6_spill] sm:$0xff] %v963_v29  ;;  %1577 = vst [vmem:[#allocation7_spill] sm:$0xff] %v965_v30  ;;  %v422_v31 = vsel %vm418_vm1, %v952_v22, %v965_v30 }
  0xae   :  { %v971_v33 = vsub.f32 %v374_v39, %v422_v31  ;;  %v289_v31 = vsub.f32 %v719_v1, %v743_v5 }
  0xb0   :  { %1578 = vst [vmem:[#allocation8_spill] sm:$0xff] %v971_v33  ;;  %v977_v35 = vpop.permute.xlu1 %416  ;;  %v979_v38 = vpop.permute.xlu0 %414 }
  0xb1   :  { %1579 = vst [vmem:[#allocation9_spill] sm:$0xff] %v977_v35  ;;  %1580 = vst [vmem:[#allocation10_spill] sm:$0xff] %v979_v38  ;;  %v434_v39 = vsel %vm418_vm1, %v977_v35, %v909_v51  ;;  %v420_v41 = vsel %vm418_vm1, %v963_v29, %v979_v38  ;;  %v23_v38 = vrot.slane %v984_v16, %v1000_v58 }
  0xb2   :  { %v994_v42 = vsub.f32 %v370_v48, %v434_v39  ;;  %v996_v45 = vsub.f32 %v372_v43, %v420_v41  ;;  %v1011_v48 = vld [vmem:[%s1558_s1 + $0x1] ss:$4 sm:$0xff]  ;;  %v1013_v43 = vsub.s32 2, %v17_v27  ;;  %v290_v39 = vsub.f32 %v731_v3, %v738_v4  ;;  %v1074_v4 = vld [vmem:[%s1558_s1 + $0x20] ss:$4 sm:$0xff] }
  0xb3   :  { %v1021_v41 = vsub.s32 4, %v17_v27  ;;  %v304_v35 = vmul.f32 %v288_v62, %v288_v62  ;;  %v305_v29 = vmul.f32 %v289_v31, %v289_v31  ;;  %v31_v62 = vrot.slane %v984_v16, %v1017_v37 }
  0xb4   :  { %1581 = vst [vmem:[#allocation11_spill] sm:$0xff] %v994_v42  ;;  %1582 = vst [vmem:[#allocation12_spill] sm:$0xff] %v996_v45  ;;  %v1004_v20 = vpop.permute.xlu1 %501  ;;  %v1006_v25 = vpop.permute.xlu0 %499  ;;  %v291_v45 = vsub.f32 %v714_v0, %v755_v7  ;;  %v27_v30 = vrot.slane %v984_v16, %v1013_v43  ;;  %v292_v0 = vsub.f32 %v726_v2, %v750_v6  ;;  %v1049_v31 = vsub.s32 6, %v17_v27 }
  0xb5   :  { %1583 = vst [vmem:[#allocation13_spill] sm:$0xff] %v1004_v20  ;;  %1584 = vst [vmem:[#allocation14_spill] sm:$0xff] %v1006_v25  ;;  %v306_v42 = vmul.f32 %v290_v39, %v290_v39  ;;  %v293_v20 = vsub.f32 %v743_v5, %v767_v9  ;;  %v1053_v2 = vmul.f32 %v304_v35, %v23_v38 }
  0xb6   :  { %v39_v5 = vrot.slane %v984_v16, %v1037_v26  ;;  %v308_v27 = vmul.f32 %v292_v0, %v292_v0  ;;  %v43_v0 = vrot.slane %v984_v16, %v1049_v31  ;;  %v47_v7 = vrot.slane %v984_v16, %v1055_v40 }
  0xb7   :  { %v1078_v35 = vmul.f32 %v306_v42, %v31_v62  ;;  %v51_v42 = vrot.slane %v1074_v4, %v973_v34  ;;  %v1640_v17 = vrot.slane %v1074_v4, %v1049_v31 }
  0xb8   :  { %v1031_v33 = vpop.permute.xlu1 %505  ;;  %v1033_v44 = vpop.permute.xlu0 %503  ;;  %v1105_v25 = vmul.f32 %v308_v27, %v39_v5  ;;  %v133_v5 = vrot.slane %v1011_v48, %v1055_v40 }
  0xb9   :  { %1586 = vst [vmem:[#allocation16_spill] sm:$0xff] %v1031_v33  ;;  %1587 = vst [vmem:[#allocation17_spill] sm:$0xff] %v1033_v44  ;;  %v35_v33 = vrot.slane %v984_v16, %v1021_v41  ;;  %v307_v44 = vmul.f32 %v291_v45, %v291_v45  ;;  %v1065_v45 = vmul.f32 %v305_v29, %v27_v30 }
  0xba   :  { %v296_v29 = vsub.f32 %v750_v6, %v774_v10  ;;  %v297_v30 = vsub.f32 %v767_v9, %v791_v13  ;;  %v1097_v6 = vld [vmem:[%s1558_s1 + $0x21] ss:$4 sm:$0xff]  ;;  %v310_v9 = vmul.f32 %v294_v54, %v294_v54  ;;  %v298_v16 = vsub.f32 %v762_v8, %v786_v12 }
  0xbb   :  { %v1084_v38 = vmul.f32 %v307_v44, %v35_v33  ;;  %v311_v44 = vmul.f32 %v295_v46, %v295_v46  ;;  %v59_v46 = vrot.slane %v1074_v4, %v1013_v43  ;;  %v137_v27 = vrot.slane %v1097_v6, %v973_v34 }
  0xbc   :  { %v1061_v39 = vpop.permute.xlu1 %509  ;;  %v1063_v49 = vpop.permute.xlu0 %507  ;;  %v312_v54 = vmul.f32 %v296_v29, %v296_v29  ;;  %v302_v8 = vsub.f32 %v786_v12, %v731_v3  ;;  %v67_v3 = vrot.slane %v1074_v4, %v1021_v41  ;;  %v314_v12 = vmul.f32 %v298_v16, %v298_v16 }
  0xbd   :  { %1588 = vst [vmem:[#allocation18_spill] sm:$0xff] %v1061_v39  ;;  %1589 = vst [vmem:[#allocation19_spill] sm:$0xff] %v1063_v49  ;;  %v309_v39 = vmul.f32 %v293_v20, %v293_v20  ;;  %v299_v49 = vsub.f32 %v779_v11, %v803_v15  ;;  %v1123_v11 = vmul.f32 %v310_v9, %v47_v7 }
  0xbe   :  { %1590 = vst [vmem:[#allocation20_spill] sm:$0xff] %v1084_v38  ;;  %v55_v38 = vrot.slane %v1074_v4, %v1000_v58  ;;  %v1125_v15 = vmul.f32 %v311_v44, %v51_v42  ;;  %v79_v20 = vrot.slane %v1074_v4, %v1055_v40  ;;  %v318_v16 = vmul.f32 %v302_v8, %v302_v8 }
  0xbf   :  { %v315_v7 = vmul.f32 %v299_v49, %v299_v49  ;;  %v301_v49 = vsub.f32 %v791_v13, %v719_v1  ;;  %v429_v1 = vsel %vm418_vm1, %v924_v57, %v922_v56  ;;  %v1187_v56 = vld [vmem:[%s1558_s1 + $0x2] ss:$4 sm:$0xff] }
  0xc0   :  { %v1099_v33 = vpop.permute.xlu1 %513  ;;  %v1101_v62 = vpop.permute.xlu0 %511  ;;  %v1141_v9 = vmul.f32 %v312_v54, %v55_v38  ;;  %v431_v38 = vsel %vm418_vm1, %v914_v53, %v912_v52  ;;  %v1595_v52 = vrot.slane %v1011_v48, %v1000_v58 }
  0xc1   :  { %1591 = vst [vmem:[#allocation21_spill] sm:$0xff] %v1099_v33  ;;  %1592 = vst [vmem:[#allocation22_spill] sm:$0xff] %v1101_v62  ;;  %v313_v33 = vmul.f32 %v297_v30, %v297_v30  ;;  %v1115_v62 = vmul.f32 %v309_v39, %v43_v0  ;;  %v300_v39 = vsub.f32 %v774_v10, %v798_v14 }
  0xc2   :  { %v63_v0 = vrot.slane %v1074_v4, %v1017_v37  ;;  %v433_v14 = vsel %vm418_vm1, %v909_v51, %v907_v50  ;;  %v1173_v8 = vmul.f32 %v315_v7, %v67_v3  ;;  %v437_v57 = vsub.f32 %v859_v23, %v431_v38 }
  0xc3   :  { %v1143_v44 = vmul.f32 %v313_v33, %v59_v46  ;;  %v71_v46 = vrot.slane %v1074_v4, %v1037_v26  ;;  %v316_v54 = vmul.f32 %v300_v39, %v300_v39  ;;  %v435_v53 = vsub.f32 %v899_v47, %v433_v14 }
  0xc4   :  { %v1131_v29 = vpop.permute.xlu1 %517  ;;  %v1133_v30 = vpop.permute.xlu0 %515  ;;  %v1171_v13 = vmul.f32 %v314_v12, %v63_v0  ;;  %v427_v47 = vsel %vm418_vm1, %v934_v61, %v932_v60  ;;  %v1194_v0 = vmul.f32 %v318_v16, %v79_v20  ;;  %v1196_v3 = vmul.f32 %v301_v49, %v301_v49  ;;  %v1225_v49 = vld [vmem:[%s1558_s1 + $0x22] ss:$4 sm:$0xff] }
  0xc5   :  { %v439_v12 = vsub.f32 %v869_v28, %v429_v1  ;;  %v425_v7 = vsel %vm418_vm1, %v944_v19, %v942_v18  ;;  %v1203_v14 = vmul.f32 %v316_v54, %v71_v46  ;;  %v191_v60 = vrot.slane %v1187_v56, %v973_v34 }
  0xc6   :  { %v451_v18 = vmul.f32 %v435_v53, %v435_v53  ;;  %v452_v19 = vmul.f32 %v920_v55, %v920_v55  ;;  %v441_v20 = vsub.f32 %v877_v32, %v427_v47  ;;  %v453_v46 = vmul.f32 %v437_v57, %v437_v57 }
  0xc7   :  { %1593 = vst [vmem:[#allocation23_spill] sm:$0xff] %v1203_v14  ;;  %v443_v54 = vsub.f32 %v883_v36, %v425_v7  ;;  %v454_v32 = vmul.f32 %v930_v59, %v930_v59  ;;  %v455_v55 = vmul.f32 %v439_v12, %v439_v12  ;;  %v456_v47 = vmul.f32 %v940_v63, %v940_v63 }
  0xc8   :  { %v1163_v50 = vpop.permute.xlu1 %521  ;;  %v1165_v51 = vpop.permute.xlu0 %519  ;;  %v1594_v63 = vrot.slane %v1011_v48, %v973_v34  ;;  %v468_v36 = vmul.f32 %v452_v19, %v1595_v52  ;;  %v457_v53 = vmul.f32 %v441_v20, %v441_v20  ;;  %v1596_v7 = vrot.slane %v1011_v48, %v1013_v43 }
  0xc9   :  { %v458_v59 = vmul.f32 %v950_v21, %v950_v21  ;;  %v459_v12 = vmul.f32 %v443_v54, %v443_v54  ;;  %v1598_v52 = vrot.slane %v1011_v48, %v1021_v41  ;;  %v1599_v20 = vrot.slane %v1011_v48, %v1037_v26 }
  0xca   :  { %v467_v33 = vmul.f32 %v451_v18, %v1594_v63  ;;  %v469_v1 = vmul.f32 %v453_v46, %v1596_v7  ;;  %v1597_v18 = vrot.slane %v1011_v48, %v1017_v37  ;;  %v423_v21 = vsel %vm418_vm1, %v954_v24, %v952_v22  ;;  %v1600_v7 = vld [vmem:[#allocation14_spill] sm:$0xff] }
  0xcb   :  { %v471_v19 = vmul.f32 %v455_v55, %v1598_v52  ;;  %v472_v57 = vmul.f32 %v456_v47, %v1599_v20  ;;  %v1601_v52 = vld [vmem:[#allocation15_spill] sm:$0xff]  ;;  %v484_v24 = vadd.f32 %v468_v36, %v1053_v2  ;;  %v1602_v20 = vrot.slane %v1011_v48, %v1049_v31  ;;  %v1604_v2 = vld [vmem:[#allocation20_spill] sm:$0xff] }
  0xcc   :  { %v1206_v23 = vpop.permute.xlu1 %525  ;;  %v1208_v38 = vpop.permute.xlu0 %523  ;;  %v470_v63 = vmul.f32 %v454_v32, %v1597_v18  ;;  %v483_v22 = vadd.f32 %v467_v33, %v1601_v52  ;;  %v485_v61 = vadd.f32 %v469_v1, %v1065_v45  ;;  %v474_v28 = vmul.f32 %v458_v59, %v133_v5  ;;  %v1603_v18 = vld [vmem:[#allocation2_spill] sm:$0xff]  ;;  %v1605_v1 = vld [vmem:[#allocation13_spill] sm:$0xff] }
  0xcd   :  { %v473_v16 = vmul.f32 %v457_v53, %v1602_v20  ;;  %v475_v47 = vmul.f32 %v459_v12, %v137_v27  ;;  %v445_v14 = vsub.f32 %v1603_v18, %v423_v21  ;;  %v487_v36 = vadd.f32 %v471_v19, %v1604_v2  ;;  %v1606_v5 = vld [vmem:[#allocation17_spill] sm:$0xff]  ;;  %v1608_v18 = vld [vmem:[#allocation6_spill] sm:$0xff]  ;;  %v1609_v20 = vld [vmem:[#allocation7_spill] sm:$0xff] }
  0xce   :  { %v486_v33 = vadd.f32 %v470_v63, %v1078_v35  ;;  %v1307_v52 = vadd.f32 %v472_v57, %v1105_v25  ;;  %v546_v48 = vsel %vm531_vm2, %v1600_v7, %v1605_v1  ;;  %v545_v27 = vsel %vm531_vm2, %v1605_v1, %v1606_v5  ;;  %v1607_v21 = vld [vmem:[#allocation5_spill] sm:$0xff] }
  0xcf   :  { %v1325_v63 = vadd.f32 %v474_v28, %v1123_v11  ;;  %v1328_v19 = vadd.f32 %v475_v47, %v1125_v15  ;;  %v1611_v15 = vld [vmem:[#allocation19_spill] sm:$0xff] }
  0xd0   :  { %v1236_v10 = vpop.permute.xlu1 %529  ;;  %v1238_v39 = vpop.permute.xlu0 %527 }
  0xd1   :  { %v547_v32 = vsel %vm531_vm2, %v1236_v10, %v1600_v7  ;;  %v460_v7 = vmul.f32 %v1607_v21, %v1607_v21 }
  0xd4   :  { %v551_v46 = vpop.permute.xlu1 %550  ;;  %v1278_v54 = vpop.permute.xlu0 %548 }
  0xd5   :  { %v595_v55 = vsel %vm580_vm3, %v1278_v54, %v551_v46 }
  0xd6   :  { %v597_v42 = vsub.f32 %v547_v32, %v595_v55  ;;  %v461_v55 = vmul.f32 %v445_v14, %v445_v14 }
  0xd8   :  { %v613_v53 = vmul.f32 %v597_v42, %v597_v42  ;;  %v555_v32 = vpop.permute.xlu1 %554  ;;  %v553_v45 = vpop.permute.xlu0 %552  ;;  %v1322_v42 = vadd.f32 %v473_v16, %v1115_v62 }
  0xd9   :  { %v593_v35 = vsel %vm580_vm3, %v553_v45, %v555_v32  ;;  %v594_v25 = vsel %vm580_vm3, %v551_v46, %v553_v45  ;;  %v421_v46 = vsel %vm418_vm1, %v1609_v20, %v1608_v18  ;;  %v1610_v45 = vld [vmem:[#allocation16_spill] sm:$0xff] }
  0xda   :  { %v629_v57 = vmul.f32 %v613_v53, %v191_v60  ;;  %v598_v59 = vsub.f32 %v546_v48, %v594_v25  ;;  %v599_v12 = vsub.f32 %v545_v27, %v593_v35  ;;  %v544_v11 = vsel %vm531_vm2, %v1606_v5, %v1610_v45  ;;  %v1617_v18 = vld [vmem:[#allocation8_spill] sm:$0xff] }
  0xdb   :  { %v543_v14 = vsel %vm531_vm2, %v1610_v45, %v1611_v15  ;;  %v1613_v48 = vrot.slane %v1187_v56, %v1013_v43  ;;  %v1614_v25 = vrot.slane %v1097_v6, %v1000_v58  ;;  %v462_v20 = vmul.f32 %v1617_v18, %v1617_v18 }
  0xdc   :  { %v645_v62 = vadd.f32 %v629_v57, %v483_v22  ;;  %v614_v16 = vmul.f32 %v598_v59, %v598_v59  ;;  %v615_v60 = vmul.f32 %v599_v12, %v599_v12  ;;  %v559_v2 = vpop.permute.xlu1 %558  ;;  %v557_v53 = vpop.permute.xlu0 %556  ;;  %v1612_v22 = vrot.slane %v1187_v56, %v1000_v58  ;;  %v1616_v12 = vld [vmem:[#allocation3_spill] sm:$0xff] }
  0xdd   :  { %v591_v28 = vsel %vm580_vm3, %v557_v53, %v559_v2  ;;  %v592_v47 = vsel %vm580_vm3, %v555_v32, %v557_v53  ;;  %v476_v57 = vmul.f32 %v460_v7, %v1614_v25  ;;  %v1615_v32 = vrot.slane %v1097_v6, %v1013_v43  ;;  %v1623_v25 = vld [vmem:[#allocation9_spill] sm:$0xff] }
  0xde   :  { %663 = vst [vmem:[%s1559_s2] sm:$0xff] %v645_v62  ;;  %v630_v1 = vmul.f32 %v614_v16, %v1612_v22  ;;  %v631_v5 = vmul.f32 %v615_v60, %v1613_v48  ;;  %v600_v27 = vsub.f32 %v544_v11, %v592_v47  ;;  %v601_v35 = vsub.f32 %v543_v14, %v591_v28  ;;  %v1618_v14 = vld [vmem:[#allocation18_spill] sm:$0xff] }
  0xdf   :  { %v477_v59 = vmul.f32 %v461_v55, %v1615_v32  ;;  %v447_v21 = vsub.f32 %v1616_v12, %v421_v46  ;;  %v542_v7 = vsel %vm531_vm2, %v1611_v15, %v1618_v14  ;;  %v1619_v28 = vld [vmem:[#allocation22_spill] sm:$0xff]  ;;  %v1621_v47 = vrot.slane %v1187_v56, %v1021_v41 }
  0xe0   :  { %v646_v62 = vadd.f32 %v630_v1, %v484_v24  ;;  %v647_v16 = vadd.f32 %v631_v5, %v485_v61  ;;  %v616_v53 = vmul.f32 %v600_v27, %v600_v27  ;;  %v617_v45 = vmul.f32 %v601_v35, %v601_v35  ;;  %v563_v60 = vpop.permute.xlu1 %562  ;;  %v561_v11 = vpop.permute.xlu0 %560  ;;  %v1624_v32 = vld [vmem:[#allocation10_spill] sm:$0xff] }
  0xe1   :  { %v541_v55 = vsel %vm531_vm2, %v1618_v14, %v1619_v28  ;;  %v589_v46 = vsel %vm580_vm3, %v561_v11, %v563_v60  ;;  %v590_v61 = vsel %vm580_vm3, %v559_v2, %v561_v11  ;;  %v1620_v24 = vrot.slane %v1187_v56, %v1017_v37  ;;  %v1625_v14 = vld [vmem:[#allocation21_spill] sm:$0xff] }
  0xe2   :  { %664 = vst [vmem:[%s1559_s2 + $0x8] sm:$0xff] %v646_v62  ;;  %665 = vst [vmem:[%s1559_s2 + $0x10] sm:$0xff] %v647_v16  ;;  %v633_v22 = vmul.f32 %v617_v45, %v1621_v47  ;;  %v602_v1 = vsub.f32 %v542_v7, %v590_v61  ;;  %v603_v48 = vsub.f32 %v541_v55, %v589_v46  ;;  %v1629_v47 = vld [vmem:[#allocation4_spill] sm:$0xff] }
  0xe3   :  { %v632_v15 = vmul.f32 %v616_v53, %v1620_v24  ;;  %v1391_v2 = vadd.f32 %v476_v57, %v1141_v9  ;;  %v463_v5 = vmul.f32 %v447_v21, %v447_v21  ;;  %v1622_v27 = vrot.slane %v1097_v6, %v1017_v37 }
  0xe4   :  { %v419_v12 = vsel %vm418_vm1, %v1624_v32, %v1623_v25  ;;  %v649_v62 = vadd.f32 %v633_v22, %v487_v36  ;;  %v618_v16 = vmul.f32 %v602_v1, %v602_v1  ;;  %v619_v53 = vmul.f32 %v603_v48, %v603_v48  ;;  %v567_v45 = vpop.permute.xlu1 %566  ;;  %v565_v11 = vpop.permute.xlu0 %564 }
  0xe5   :  { %v478_v35 = vmul.f32 %v462_v20, %v1622_v27  ;;  %v648_v18 = vadd.f32 %v632_v15, %v486_v33  ;;  %v540_v9 = vsel %vm531_vm2, %v1619_v28, %v1625_v14  ;;  %v539_v57 = vsel %vm531_vm2, %v1625_v14, %v1133_v30 }
  0xe6   :  { %v587_v21 = vsel %vm580_vm3, %v565_v11, %v567_v45  ;;  %v588_v33 = vsel %vm580_vm3, %v563_v60, %v565_v11  ;;  %667 = vst [vmem:[%s1559_s2 + $0x20] sm:$0xff] %v649_v62  ;;  %v1626_v36 = vrot.slane %v1187_v56, %v1037_v26  ;;  %v1627_v7 = vrot.slane %v1187_v56, %v1049_v31 }
  0xe7   :  { %666 = vst [vmem:[%s1559_s2 + $0x18] sm:$0xff] %v648_v18  ;;  %v604_v55 = vsub.f32 %v540_v9, %v588_v33  ;;  %v605_v46 = vsub.f32 %v539_v57, %v587_v21  ;;  %v493_v60 = vadd.f32 %v477_v59, %v1143_v44  ;;  %v1628_v61 = vrot.slane %v1097_v6, %v1021_v41 }
  0xe8   :  { %v634_v20 = vmul.f32 %v618_v16, %v1626_v36  ;;  %v635_v28 = vmul.f32 %v619_v53, %v1627_v7  ;;  %v494_v15 = vadd.f32 %v478_v35, %v1171_v13  ;;  %v449_v22 = vsub.f32 %v1629_v47, %v419_v12  ;;  %v571_v32 = vpop.permute.xlu1 %570  ;;  %v569_v18 = vpop.permute.xlu0 %568  ;;  %v1632_v16 = vld [vmem:[#allocation11_spill] sm:$0xff] }
  0xe9   :  { %v479_v24 = vmul.f32 %v463_v5, %v1628_v61  ;;  %v620_v27 = vmul.f32 %v604_v55, %v604_v55  ;;  %v621_v25 = vmul.f32 %v605_v46, %v605_v46  ;;  %v538_v44 = vsel %vm531_vm2, %v1133_v30, %v1131_v29 }
  0xea   :  { %v650_v1 = vadd.f32 %v634_v20, %v1307_v52  ;;  %v651_v48 = vadd.f32 %v635_v28, %v1322_v42  ;;  %v537_v13 = vsel %vm531_vm2, %v1131_v29, %v1165_v51  ;;  %v585_v59 = vsel %vm580_vm3, %v569_v18, %v571_v32 }
  0xeb   :  { %v586_v52 = vsel %vm580_vm3, %v567_v45, %v569_v18  ;;  %v1630_v30 = vrot.slane %v1187_v56, %v1055_v40  ;;  %v1631_v29 = vrot.slane %v1225_v49, %v973_v34  ;;  %v607_v12 = vsub.f32 %v537_v13, %v585_v59  ;;  %v1633_v45 = vld [vmem:[#allocation12_spill] sm:$0xff] }
  0xec   :  { %668 = vst [vmem:[%s1559_s2 + $0x28] sm:$0xff] %v650_v1  ;;  %669 = vst [vmem:[%s1559_s2 + $0x30] sm:$0xff] %v651_v48  ;;  %v606_v35 = vsub.f32 %v538_v44, %v586_v52  ;;  %v495_v62 = vadd.f32 %v479_v24, %v1173_v8  ;;  %v466_v53 = vmul.f32 %v1632_v16, %v1632_v16  ;;  %v575_v33 = vpop.permute.xlu1 %574  ;;  %v573_v34 = vpop.permute.xlu0 %572 }
  0xed   :  { %v636_v42 = vmul.f32 %v620_v27, %v1630_v30  ;;  %v637_v5 = vmul.f32 %v621_v25, %v1631_v29  ;;  %v464_v11 = vmul.f32 %v1633_v45, %v1633_v45  ;;  %v465_v14 = vmul.f32 %v449_v22, %v449_v22 }
  0xee   :  { %v622_v57 = vmul.f32 %v606_v35, %v606_v35  ;;  %v623_v21 = vmul.f32 %v607_v12, %v607_v12  ;;  %v536_v8 = vsel %vm531_vm2, %v1165_v51, %v1163_v50  ;;  %v535_v36 = vsel %vm531_vm2, %v1163_v50, %v1208_v38 }
  0xef   :  { %v652_v9 = vadd.f32 %v636_v42, %v1325_v63  ;;  %v653_v56 = vadd.f32 %v637_v5, %v1328_v19  ;;  %v583_v20 = vsel %vm580_vm3, %v573_v34, %v575_v33  ;;  %v584_v63 = vsel %vm580_vm3, %v571_v32, %v573_v34 }
  0xf0   :  { %v1634_v51 = vrot.slane %v1225_v49, %v1000_v58  ;;  %v1635_v50 = vrot.slane %v1225_v49, %v1013_v43  ;;  %v608_v28 = vsub.f32 %v536_v8, %v584_v63  ;;  %v609_v55 = vsub.f32 %v535_v36, %v583_v20  ;;  %v579_v25 = vpop.permute.xlu1 %578  ;;  %v577_v32 = vpop.permute.xlu0 %576 }
  0xf1   :  { %670 = vst [vmem:[%s1559_s2 + $0x38] sm:$0xff] %v652_v9  ;;  %671 = vst [vmem:[%s1559_s2 + $0x40] sm:$0xff] %v653_v56  ;;  %v1636_v46 = vrot.slane %v1097_v6, %v1055_v40  ;;  %v1637_v24 = vrot.slane %v1097_v6, %v1037_v26  ;;  %v534_v58 = vsel %vm531_vm2, %v1208_v38, %v1206_v23 }
  0xf2   :  { %v638_v19 = vmul.f32 %v622_v57, %v1634_v51  ;;  %v639_v7 = vmul.f32 %v623_v21, %v1635_v50  ;;  %v532_v43 = vsel %vm531_vm2, %v1238_v39, %v1236_v10  ;;  %v624_v48 = vmul.f32 %v608_v28, %v608_v28 }
  0xf3   :  { %v482_v61 = vmul.f32 %v466_v53, %v1636_v46  ;;  %v480_v47 = vmul.f32 %v464_v11, %v1637_v24  ;;  %v625_v27 = vmul.f32 %v609_v55, %v609_v55  ;;  %v533_v18 = vsel %vm531_vm2, %v1206_v23, %v1238_v39  ;;  %v1642_v53 = vld [vmem:[#allocation23_spill] sm:$0xff] }
  0xf4   :  { %v654_v22 = vadd.f32 %v638_v19, %v1391_v2  ;;  %v655_v1 = vadd.f32 %v639_v7, %v493_v60  ;;  %v596_v38 = vsel %vm580_vm3, %v579_v25, %v1278_v54  ;;  %v581_v44 = vsel %vm580_vm3, %v577_v32, %v579_v25 }
  0xf5   :  { %v582_v10 = vsel %vm580_vm3, %v575_v33, %v577_v32  ;;  %v1638_v39 = vrot.slane %v1225_v49, %v1017_v37  ;;  %v1639_v54 = vrot.slane %v1225_v49, %v1021_v41  ;;  %v612_v60 = vsub.f32 %v532_v43, %v596_v38 }
  0xf6   :  { %672 = vst [vmem:[%s1559_s2 + $0x48] sm:$0xff] %v654_v22  ;;  %673 = vst [vmem:[%s1559_s2 + $0x50] sm:$0xff] %v655_v1  ;;  %v610_v13 = vsub.f32 %v534_v58, %v582_v10  ;;  %v333_v59 = vmul.f32 %v1196_v3, %v1640_v17  ;;  %v1641_v52 = vrot.slane %v1097_v6, %v1049_v31 }
  0xf7   :  { %v640_v23 = vmul.f32 %v624_v48, %v1638_v39  ;;  %v641_v2 = vmul.f32 %v625_v27, %v1639_v54  ;;  %v247_v42 = vrot.slane %v1225_v49, %v1049_v31  ;;  %v611_v37 = vsub.f32 %v533_v18, %v581_v44 }
  0xf8   :  { %v481_v30 = vmul.f32 %v465_v14, %v1641_v52  ;;  %v628_v35 = vmul.f32 %v612_v60, %v612_v60  ;;  %v626_v41 = vmul.f32 %v610_v13, %v610_v13  ;;  %v498_v16 = vadd.f32 %v482_v61, %v1194_v0 }
  0xf9   :  { %v656_v29 = vadd.f32 %v640_v23, %v494_v15  ;;  %v657_v5 = vadd.f32 %v641_v2, %v495_v62  ;;  %v627_v12 = vmul.f32 %v611_v37, %v611_v37  ;;  %v496_v45 = vadd.f32 %v480_v47, %v1642_v53 }
  0xfa   :  { %v1643_v31 = vrot.slane %v1225_v49, %v1055_v40  ;;  %v1644_v6 = vrot.slane %v1225_v49, %v1037_v26  ;;  %v497_v15 = vadd.f32 %v481_v30, %v333_v59 }
  0xfb   :  { %674 = vst [vmem:[%s1559_s2 + $0x58] sm:$0xff] %v656_v29  ;;  %675 = vst [vmem:[%s1559_s2 + $0x60] sm:$0xff] %v657_v5  ;;  %v643_v0 = vmul.f32 %v627_v12, %v247_v42 }
  0xfc   :  { %v644_v4 = vmul.f32 %v628_v35, %v1643_v31  ;;  %v642_v3 = vmul.f32 %v626_v41, %v1644_v6 }
  0xfd   :  { %v659_v14 = vadd.f32 %v643_v0, %v497_v15 }
  0xfe   :  { %v660_v62 = vadd.f32 %v644_v4, %v498_v16  ;;  %v658_v11 = vadd.f32 %v642_v3, %v496_v45 }
  0xff   :  { %677 = vst [vmem:[%s1559_s2 + $0x70] sm:$0xff] %v659_v14 }
 0x100   :  { %678 = vst [vmem:[%s1559_s2 + $0x78] sm:$0xff] %v660_v62  ;;  %676 = vst [vmem:[%s1559_s2 + $0x68] sm:$0xff] %v658_v11 }

</bundles_post_ra>
